<compile_context>
chip_gen: v5e
topology: v5e:2x2
jax: 0.10.0
libtpu: 0.0.40
codegen_flags: <defaults>
</compile_context>

<pallas_src>
import functools

import jax
import jax.numpy as jnp
from jax.experimental import pallas as pl
from jax.experimental.pallas import tpu as pltpu

HIDDEN = 32          # fixed by the module (Linear(., 32), Linear(32, 32))
SLAB_LANES = HIDDEN  # 32-lane slab: every weight load is full lane width
MAX_TILE = 16384     # rows; per-step DMA then dwarfs the ~0.35 us grid-step overhead
_LANE = 128


def _round_up(x: int, m: int) -> int:
    return (x + m - 1) // m * m


def _slab_offsets(in_pad: int):
    """Row offsets of each parameter inside the packed slab (all 8-aligned)."""
    off_w1 = 0
    off_b1 = off_w1 + in_pad      # bias rows get a full 8-row segment (row 0 used)
    off_w2 = off_b1 + 8
    off_b2 = off_w2 + HIDDEN
    off_w3 = off_b2 + 8
    off_b3 = off_w3 + HIDDEN
    rows = off_b3 + 8             # total rows, multiple of 8
    return off_w1, off_b1, off_w2, off_b2, off_w3, off_b3, rows


def _vmem_capacity_bytes() -> int:
    """Physical VMEM of the local chip (per TensorCore); conservative fallback."""
    try:
        return int(pltpu.get_tpu_info().vmem_capacity_bytes)
    except Exception:
        return 64 * 1024 * 1024   # v7x has 64 MiB/TC; v5e/v6e have 128 MiB


def _per_row_vmem_bytes(x_itemsize: int) -> int:
    """Conservative VMEM bytes per batch row (blocks <128 lanes pad to 128 lanes)."""
    x_bufs = 2 * _LANE * x_itemsize   # double-buffered x block
    o_bufs = 2 * _LANE * 4            # double-buffered f32 out block
    interm = 6 * _LANE * 4            # h1/h2/pre-store activations (f32, conservative)
    return x_bufs + o_bufs + interm


def _pick_batch_tile(B: int, x_itemsize: int, vmem_capacity: int) -> int:
    budget = int(vmem_capacity * 0.6)                 # headroom for compiler scratch
    cap = max(8, (budget // _per_row_vmem_bytes(x_itemsize)) // 8 * 8)
    cap = min(cap, MAX_TILE)
    if B <= 16:
        return min(_round_up(max(B, 1), 8), cap)
    # Aim for >= 2 grid steps so v7x's two TensorCores both get a share.
    return min(cap, _round_up((B + 1) // 2, 8))


def _mlp_kernel(x_ref, p_ref, o_ref, *, in_dim, in_pad, out_dim,
                compute_dtype, precision):
    """One batch tile: o = relu(relu(x@W1+b1)@W2+b2)@W3+b3 (f32 accumulation)."""
    off_w1, off_b1, off_w2, off_b2, off_w3, off_b3, _ = _slab_offsets(in_pad)

    # Full-lane-width static slices of the resident parameter slab (no extra DMAs,
    # no masked lane slices).
    w1 = p_ref[pl.ds(off_w1, in_dim), :]                    # [in_dim, 32]
    b1 = p_ref[pl.ds(off_b1, 1), :].astype(jnp.float32)     # [1, 32]
    w2 = p_ref[pl.ds(off_w2, HIDDEN), :]                    # [32, 32]
    b2 = p_ref[pl.ds(off_b2, 1), :].astype(jnp.float32)
    w3 = p_ref[pl.ds(off_w3, HIDDEN), :]                    # [32, 32] (cols >= out_dim are zero)
    b3 = p_ref[pl.ds(off_b3, 1), :].astype(jnp.float32)

    x = x_ref[...].astype(compute_dtype)                    # [TB, in_dim]

    # Layer 1: Linear(in_dim, 32) + ReLU  (MXU matmul, f32 accumulate)
    h1 = jnp.dot(x, w1, preferred_element_type=jnp.float32, precision=precision) + b1
    h1 = jnp.maximum(h1, 0.0).astype(compute_dtype)

    # Layer 2: Linear(32, 32) + ReLU
    h2 = jnp.dot(h1, w2, preferred_element_type=jnp.float32, precision=precision) + b2
    h2 = jnp.maximum(h2, 0.0).astype(compute_dtype)

    # Layer 3: Linear(32, out_dim) -- full-width matmul, slice only at the store.
    out = jnp.dot(h2, w3, preferred_element_type=jnp.float32, precision=precision) + b3
    o_ref[...] = out[:, :out_dim].astype(o_ref.dtype)


def pack_params(params, in_dim: int, out_dim: int, dtype=jnp.bfloat16):
    """Pack (w1,b1,w2,b2,w3,b3) into one zero-padded [rows, 32] slab.

    Weights are stored [in, out] (already transposed from torch's [out, in]).
    Zero padding is semantically inert (padded w3 columns are dropped at the store).
    """
    in_pad = _round_up(max(in_dim, 8), 8)
    off_w1, off_b1, off_w2, off_b2, off_w3, off_b3, rows = _slab_offsets(in_pad)

    slab = jnp.zeros((rows, SLAB_LANES), dtype)
    slab = slab.at[off_w1:off_w1 + in_dim, :].set(params["w1"].astype(dtype))
    slab = slab.at[off_b1, :].set(params["b1"].reshape(-1).astype(dtype))
    slab = slab.at[off_w2:off_w2 + HIDDEN, :].set(params["w2"].astype(dtype))
    slab = slab.at[off_b2, :].set(params["b2"].reshape(-1).astype(dtype))
    slab = slab.at[off_w3:off_w3 + HIDDEN, :out_dim].set(params["w3"].astype(dtype))
    slab = slab.at[off_b3, :out_dim].set(params["b3"].reshape(-1).astype(dtype))
    return slab


def network_forward(x, param_slab, *, out_dim: int, batch_tile=None):
    """x: [B, in_dim] (float or int dtype). param_slab: output of pack_params."""
    B, in_dim = x.shape
    in_pad = _round_up(max(in_dim, 8), 8)

    compute_dtype = jnp.bfloat16 if param_slab.dtype == jnp.bfloat16 else jnp.float32
    mxu_precision = (jax.lax.Precision.HIGHEST if compute_dtype == jnp.float32
                     else jax.lax.Precision.DEFAULT)

    # torch's forward does x.float(); f32/bf16 inputs stream straight into the kernel.
    if x.dtype not in (jnp.float32, jnp.bfloat16):
        x = x.astype(jnp.float32)

    vmem_capacity = _vmem_capacity_bytes()
    if batch_tile is None:
        TB = _pick_batch_tile(B, x.dtype.itemsize, vmem_capacity)
    else:
        TB = max(8, _round_up(batch_tile, 8))

    num_tiles = -(-B // TB)
    B_pad = num_tiles * TB

    if B_pad == B:
        x_in = x   # fast path: zero-copy, no wrapper-side pad materialization
    else:
        # Fused pad + cast, built directly in the kernel's compute dtype so the
        # dominant HBM->VMEM stream is as narrow as possible.
        pad_dtype = compute_dtype if compute_dtype == jnp.bfloat16 else jnp.float32
        x_in = jnp.zeros((B_pad, in_dim), pad_dtype).at[:B, :].set(x.astype(pad_dtype))

    kernel = functools.partial(
        _mlp_kernel, in_dim=in_dim, in_pad=in_pad, out_dim=out_dim,
        compute_dtype=compute_dtype, precision=mxu_precision)

    out = pl.pallas_call(
        kernel,
        out_shape=jax.ShapeDtypeStruct((B_pad, out_dim), jnp.float32),
        grid=(num_tiles,),
        in_specs=[
            # Batch-tiled activations: pipelined/double-buffered across the grid.
            pl.BlockSpec((TB, in_dim), lambda i: (i, 0)),
            # Single packed parameter slab, VMEM-resident (constant block index).
            # TODO(synk): pipeline_mode=pl.Buffered(1) would drop its redundant
            # second buffer (only a few KB), once single-buffered specs matter.
            pl.BlockSpec(param_slab.shape, lambda i: (0, 0)),
        ],
        out_specs=pl.BlockSpec((TB, out_dim), lambda i: (i, 0)),
        compiler_params=pltpu.CompilerParams(
            # Batch rows are independent -> shard the grid across v7x's 2 TCs.
            dimension_semantics=("parallel",),
            # Explicit limit: scoped defaults (16 MiB v5e / 32 MiB v6e,v7x) are
            # smaller than the lane-padded footprint of large batch tiles.
            vmem_limit_bytes=int(vmem_capacity * 0.9),
        ),
    )(x_in, param_slab)

    # Padded batch rows pick up the biases (nonzero garbage) -> always slice.
    return out if B_pad == B else out[:B]
    # TODO(synk): online+target DQN on the same batch: stack two slabs and add an
    # innermost size-2 grid axis (constant x index_map along it) so the dominant
    # x HBM stream is amortized across both networks.


def init_params(key, input_dim, hidden, output_dim):
    """Mimic torch Linear default init (uniform +/- 1/sqrt(fan_in)); [in, out] layout."""
    def linear_init(k, fan_in, fan_out):
        kw, kb = jax.random.split(k)
        bound = 1.0 / jnp.sqrt(fan_in)
        w = jax.random.uniform(kw, (fan_in, fan_out), jnp.float32, -bound, bound)
        b = jax.random.uniform(kb, (1, fan_out), jnp.float32, -bound, bound)
        return w, b

    k1, k2, k3 = jax.random.split(key, 3)
    w1, b1 = linear_init(k1, input_dim, hidden)
    w2, b2 = linear_init(k2, hidden, hidden)
    w3, b3 = linear_init(k3, hidden, output_dim)
    return {"w1": w1, "b1": b1, "w2": w2, "b2": b2, "w3": w3, "b3": b3}


def reference_forward(x, params, param_dtype=jnp.float32):
    """Pure-JAX reference mirroring the kernel's dtype/precision choices exactly."""
    cd = jnp.bfloat16 if param_dtype == jnp.bfloat16 else jnp.float32
    prec = jax.lax.Precision.HIGHEST if cd == jnp.float32 else jax.lax.Precision.DEFAULT

    def lin(h, w, b):
        y = jnp.dot(h.astype(cd), w.astype(param_dtype),
                    preferred_element_type=jnp.float32, precision=prec)
        return y + b.astype(param_dtype).astype(jnp.float32)

    h1 = jnp.maximum(lin(x.astype(jnp.float32), params["w1"], params["b1"]), 0.0)
    h2 = jnp.maximum(lin(h1, params["w2"], params["b2"]), 0.0)
    return lin(h2, params["w3"], params["b3"])


if __name__ == "__main__":
    key = jax.random.PRNGKey(0)
    k_params, k_x, k_x2 = jax.random.split(key, 3)

    batch = 64          # small batch; default tiling -> TB=32, 2-step grid, no pad
    input_dim = 16      # e.g. Network(input_dim=(16,), output_dim=4, lr=...)
    output_dim = 4
    params = init_params(k_params, input_dim, HIDDEN, output_dim)
    x = jax.random.normal(k_x, (batch, input_dim), jnp.float32)

    # --- f32 parameter slab: torch-exact semantics (HIGHEST-precision matmuls) ---
    slab_f32 = pack_params(params, input_dim, output_dim, jnp.float32)
    out_f32 = jax.block_until_ready(
        network_forward(x, slab_f32, out_dim=output_dim))
    ref_f32 = reference_forward(x, params, jnp.float32)
    assert out_f32.shape == (batch, output_dim)
    assert jnp.allclose(out_f32, ref_f32, atol=1e-4, rtol=1e-4), "f32 mismatch"

    # --- bf16 slab + bf16 activation stream: perf config (half the HBM bytes) ----
    slab_bf16 = pack_params(params, input_dim, output_dim, jnp.bfloat16)
    out_bf16 = jax.block_until_ready(
        network_forward(x.astype(jnp.bfloat16), slab_bf16, out_dim=output_dim))
    ref_bf16 = reference_forward(x, params, jnp.bfloat16)
    assert jnp.allclose(out_bf16, ref_bf16, atol=2e-2, rtol=2e-2), "bf16 mismatch"

    # --- ragged batch: exercises the fused pad+cast slow path + out[:B] slice ----
    x_odd = jax.random.normal(k_x2, (50, input_dim), jnp.float32)
    out_odd = jax.block_until_ready(
        network_forward(x_odd, slab_bf16, out_dim=output_dim, batch_tile=16))
    ref_odd = reference_forward(x_odd, params, jnp.bfloat16)
    assert out_odd.shape == (50, output_dim)
    assert jnp.allclose(out_odd, ref_odd, atol=2e-2, rtol=2e-2), "padded-batch mismatch"

    print("KERNEL_OK")
</pallas_src>

<mosaic_0001>
module attributes {stable_mosaic.version = 11 : i64} {
  func.func @_mlp_kernel(%arg0: i32, %arg1: memref<32x16xf32, #tpu.memory_space<vmem>>, %arg2: memref<104x32xf32, #tpu.memory_space<vmem>>, %arg3: memref<32x4xf32, #tpu.memory_space<vmem>>) attributes {dimension_semantics = [#tpu.dimension_semantics<parallel>], iteration_bounds = array<i64: 2>, scalar_prefetch = 0 : i64, scratch_operands = 0 : i64, tpu.core_type = #tpu.core_type<tc>, window_params = [{transform_indices = @transform_0, window_bounds = array<i64: 32, 16>}, {pipeline_mode = #tpu.pipeline_mode<synchronous>, transform_indices = @transform_1, window_bounds = array<i64: 104, 32>}, {transform_indices = @transform_2, window_bounds = array<i64: 32, 4>}]} {
    %c0 = arith.constant 0 : index
    %c0_0 = arith.constant 0 : index
    %0 = vector.load %arg2[%c0, %c0_0] : memref<104x32xf32, #tpu.memory_space<vmem>>, vector<16x32xf32>
    %c16 = arith.constant 16 : index
    %c0_1 = arith.constant 0 : index
    %1 = vector.load %arg2[%c16, %c0_1] : memref<104x32xf32, #tpu.memory_space<vmem>>, vector<1x32xf32>
    %c24 = arith.constant 24 : index
    %c0_2 = arith.constant 0 : index
    %2 = vector.load %arg2[%c24, %c0_2] : memref<104x32xf32, #tpu.memory_space<vmem>>, vector<32x32xf32>
    %c56 = arith.constant 56 : index
    %c0_3 = arith.constant 0 : index
    %3 = vector.load %arg2[%c56, %c0_3] : memref<104x32xf32, #tpu.memory_space<vmem>>, vector<1x32xf32>
    %c64 = arith.constant 64 : index
    %c0_4 = arith.constant 0 : index
    %4 = vector.load %arg2[%c64, %c0_4] : memref<104x32xf32, #tpu.memory_space<vmem>>, vector<32x32xf32>
    %c96 = arith.constant 96 : index
    %c0_5 = arith.constant 0 : index
    %5 = vector.load %arg2[%c96, %c0_5] : memref<104x32xf32, #tpu.memory_space<vmem>>, vector<1x32xf32>
    %c0_6 = arith.constant 0 : index
    %c0_7 = arith.constant 0 : index
    %6 = vector.load %arg1[%c0_6, %c0_7] : memref<32x16xf32, #tpu.memory_space<vmem>>, vector<32x16xf32>
    %cst = arith.constant dense<0.000000e+00> : vector<32x32xf32>
    %7 = tpu.matmul %6, %0, %cst {dimension_numbers = #tpu.dot_dimension_numbers<[1], [0], [0], [1], [0, 0, 1, 1], [], []>, precision = #tpu.contract_precision<fp32>} : vector<32x16xf32>, vector<16x32xf32>, vector<32x32xf32> -> vector<32x32xf32>
    %8 = vector.broadcast %1 : vector<1x32xf32> to vector<32x32xf32>
    %9 = arith.addf %7, %8 : vector<32x32xf32>
    %cst_8 = arith.constant 0.000000e+00 : f32
    %10 = vector.broadcast %cst_8 : f32 to vector<32x32xf32>
    %11 = arith.maximumf %9, %10 : vector<32x32xf32>
    %cst_9 = arith.constant dense<0.000000e+00> : vector<32x32xf32>
    %12 = tpu.matmul %11, %2, %cst_9 {dimension_numbers = #tpu.dot_dimension_numbers<[1], [0], [0], [1], [0, 0, 1, 1], [], []>, precision = #tpu.contract_precision<fp32>} : vector<32x32xf32>, vector<32x32xf32>, vector<32x32xf32> -> vector<32x32xf32>
    %13 = vector.broadcast %3 : vector<1x32xf32> to vector<32x32xf32>
    %14 = arith.addf %12, %13 : vector<32x32xf32>
    %cst_10 = arith.constant 0.000000e+00 : f32
    %15 = vector.broadcast %cst_10 : f32 to vector<32x32xf32>
    %16 = arith.maximumf %14, %15 : vector<32x32xf32>
    %cst_11 = arith.constant dense<0.000000e+00> : vector<32x32xf32>
    %17 = tpu.matmul %16, %4, %cst_11 {dimension_numbers = #tpu.dot_dimension_numbers<[1], [0], [0], [1], [0, 0, 1, 1], [], []>, precision = #tpu.contract_precision<fp32>} : vector<32x32xf32>, vector<32x32xf32>, vector<32x32xf32> -> vector<32x32xf32>
    %18 = vector.broadcast %5 : vector<1x32xf32> to vector<32x32xf32>
    %19 = arith.addf %17, %18 : vector<32x32xf32>
    %20 = vector.extract_strided_slice %19 {offsets = [0, 0], sizes = [32, 4], strides = [1, 1]} : vector<32x32xf32> to vector<32x4xf32>
    %c0_12 = arith.constant 0 : index
    %c0_13 = arith.constant 0 : index
    %21 = vector.load %arg3[%c0_12, %c0_13] : memref<32x4xf32, #tpu.memory_space<vmem>>, vector<32x4xf32>
    tpu.vector_store %arg3[%c0_12, %c0_13], %20 {strides = array<i32>} : memref<32x4xf32, #tpu.memory_space<vmem>>, vector<32x4xf32>,
    return
  }
  func.func @transform_0(%arg0: i32) -> (i32, i32) {
    %c0_i32 = arith.constant 0 : i32
    %c0_i32_0 = arith.constant 0 : i32
    return %arg0, %c0_i32 : i32, i32
  }
  func.func @transform_1(%arg0: i32) -> (i32, i32) {
    %c0_i32 = arith.constant 0 : i32
    %c0_i32_0 = arith.constant 0 : i32
    %c0_i32_1 = arith.constant 0 : i32
    return %c0_i32, %c0_i32_0 : i32, i32
  }
  func.func @transform_2(%arg0: i32) -> (i32, i32) {
    %c0_i32 = arith.constant 0 : i32
    %c0_i32_0 = arith.constant 0 : i32
    return %arg0, %c0_i32 : i32, i32
  }
}

</mosaic_0001>

<bundles_post_ra>
// kernel: tpu_custom_call.1
= control target key start
LH: loop header
LB: loop body
LE: loop exit
PB: predicated region body
PF: predicated region fallthrough
CT: control target
= control target key end

     0   :  { %s1131_s9 = smov 0   ;;  %s1222_s0 = inlined_call_operand.vmem [shape: f32[64,16], index: 0, kind: input, shape index: {}]   ;;  %s1223_s1 = inlined_call_operand.vmem [shape: f32[104,32], index: 1, kind: input, shape index: {}]   ;;  %s1224_s2 = inlined_call_operand.vmem [shape: f32[64,4], index: 2, kind: output, shape index: {}]  }
   0x1 LB: > { %s1082_s10 = sadd.s32 4294967295, %s1114_s9   ;;  %p1086_p0 = scmp.ge.s32.totalorder %s1114_s9, 1  ;;  %s1114_s9 = sphi %s1131_s9, %s12_s9  }
   0x2   : > { %p113_p1 = scmp.lt.s32.totalorder %s1114_s9, 3 }
   0x4   : > { %p114_p2 = pnand %p1086_p0, %p113_p1 }
   0x5   : > { %s1087_s15 = sshll.u32 (!%p114_p2), %s1082_s10, 2 }
   0x6   : > { %117 = sbr.rel (%p114_p2) target bundleno = 564 (0x234), region = 28  ;;  %p136_p3 = scmp.lt.s32.totalorder (!%p114_p2), %s1087_s15, 7 }
   0xb   : > { %v148_v0 = vld [vmem:[%s1223_s1 + $0x8] sm:$0xff]  ;;  %v147_v1 = vld [vmem:[%s1223_s1] sm:$0xff]  ;;  %s1226_s15 = smov (!%p136_p3, %s1087_s15), 7  ;;  %vm165_vm0 = vcmask 130048   ;;  %v153_v40 = vld [vmem:[%s1223_s1 + $0x30] sm:$0xff]  ;;  %vm435_vm1 = vcmask 261120  }
   0xc   : > { %v192_v2 = vand.u32 4294901760, %v148_v0  ;;  %v194_v3 = vand.u32 4294901760, %v147_v1  ;;  %s1088_s16 = sshll.u32 %s1226_s15, 3  ;;  %v460_v41 = vand.u32 4294901760, %v153_v40  ;;  %v152_v45 = vld [vmem:[%s1223_s1 + $0x28] sm:$0xff]  ;;  %v151_v48 = vld [vmem:[%s1223_s1 + $0x20] sm:$0xff] }
   0xd   : > { %s139_s19 = scalar_lea.vmem %s1222_s0, %s1088_s16  ;;  %v462_v46 = vand.u32 4294901760, %v152_v45  ;;  %v464_v50 = vand.u32 4294901760, %v151_v48  ;;  %v150_v51 = vld [vmem:[%s1223_s1 + $0x18] sm:$0xff]  ;;  %vm1021_vm2 = vcmask 31744  }
   0xe   : > { %1093 = vmatpush.msra.mxu2 %v192_v2  ;;  %v244_v4 = vsub.f32 %v148_v0, %v192_v2  ;;  %v250_v5 = vsub.f32 %v147_v1, %v194_v3  ;;  %193 = vmatpush.msra.mxu0 %v192_v2  ;;  %v162_v9 = vld [vmem:[%s139_s19 + $0x10] sm:$0xff]  ;;  %v163_v11 = vld [vmem:[%s139_s19 + $0x18] sm:$0xff]  ;;  %v160_v12 = vld [vmem:[%s139_s19] sm:$0xff]  ;;  %v514_v42 = vsub.f32 %v153_v40, %v460_v41  ;;  %v466_v54 = vand.u32 4294901760, %v150_v51 }
   0xf   : > { %v173_v13 = vsel %vm165_vm0, %v162_v9, 0  ;;  %v176_v14 = vsel %vm165_vm0, %v163_v11, 0  ;;  %v167_v15 = vsel %vm165_vm0, %v160_v12, 0  ;;  %v161_v16 = vld [vmem:[%s139_s19 + $0x8] sm:$0xff]  ;;  %v520_v49 = vsub.f32 %v152_v45, %v462_v46  ;;  %s1209_s19 = scalar_lea.vmem %s1224_s2, %s1088_s16 }
  0x10   : > { %1094 = vmatpush.msra.mxu2 %v194_v3  ;;  %v245_v6 = vand.u32 4294901760, %v244_v4  ;;  %v251_v7 = vand.u32 4294901760, %v250_v5  ;;  %195 = vmatpush.msra.mxu0 %v194_v3  ;;  %v212_v18 = vand.u32 4294901760, %v173_v13  ;;  %v220_v20 = vand.u32 4294901760, %v176_v14 }
  0x11   : > { %v196_v21 = vand.u32 4294901760, %v167_v15  ;;  %v170_v22 = vsel %vm165_vm0, %v161_v16, 0  ;;  %v515_v43 = vand.u32 4294901760, %v514_v42  ;;  %v521_v52 = vand.u32 4294901760, %v520_v49 }
  0x12   : > { %288 = vmatpush.msrb.mxu2 %v244_v4  ;;  %v246_v8 = vsub.f32 %v244_v4, %v245_v6  ;;  %v252_v10 = vsub.f32 %v250_v5, %v251_v7  ;;  %373 = vmatpush.msrb.mxu0 %v245_v6  ;;  %v213_v23 = vsub.f32 %v173_v13, %v212_v18  ;;  %v204_v25 = vand.u32 4294901760, %v170_v22 }
  0x13   : > { %v221_v24 = vsub.f32 %v176_v14, %v220_v20  ;;  %v197_v26 = vsub.f32 %v167_v15, %v196_v21  ;;  %v516_v44 = vsub.f32 %v514_v42, %v515_v43  ;;  %v526_v53 = vsub.f32 %v151_v48, %v464_v50 }
  0x14   : > { %291 = vmatpush.msrb.mxu2 %v250_v5  ;;  %v247_v17 = vand.u32 4294901760, %v246_v8  ;;  %v253_v19 = vand.u32 4294901760, %v252_v10  ;;  %377 = vmatpush.msrb.mxu0 %v251_v7  ;;  %v214_v27 = vand.u32 4294901760, %v213_v23  ;;  %v205_v28 = vsub.f32 %v170_v22, %v204_v25  ;;  %v1105_v8 = vld [vmem:[%s1223_s1 + $0x10] ss:$0 sm:$0xff] }
  0x15   : > { %v198_v29 = vand.u32 4294901760, %v197_v26  ;;  %v222_v31 = vand.u32 4294901760, %v221_v24  ;;  %v517_v47 = vand.u32 4294901760, %v516_v44  ;;  %v522_v55 = vsub.f32 %v520_v49, %v521_v52 }
  0x16   : > { %1095 = vmatpush.msra.mxu3 %v247_v17  ;;  %248 = vmatpush.msra.mxu1 %v247_v17  ;;  %v215_v30 = vsub.f32 %v213_v23, %v214_v27  ;;  %v206_v33 = vand.u32 4294901760, %v205_v28  ;;  %v527_v56 = vand.u32 4294901760, %v526_v53  ;;  %v532_v57 = vsub.f32 %v150_v51, %v466_v54 }
  0x17   : > { %v199_v32 = vsub.f32 %v197_v26, %v198_v29  ;;  %v223_v36 = vsub.f32 %v221_v24, %v222_v31  ;;  %v523_v58 = vand.u32 4294901760, %v522_v55 }
  0x18   : > { %1096 = vmatpush.msra.mxu3 %v253_v19  ;;  %254 = vmatpush.msra.mxu1 %v253_v19  ;;  %v216_v34 = vand.u32 4294901760, %v215_v30  ;;  %v207_v37 = vsub.f32 %v205_v28, %v206_v33  ;;  %v528_v59 = vsub.f32 %v526_v53, %v527_v56  ;;  %v533_v60 = vand.u32 4294901760, %v532_v57 }
  0x19   : > { %264 = vmatmul.f32.vlgmr.msra.gmra.mxu3 %v212_v18  ;;  %256 = vmatmul.f32.vlgmr.msra.gmra.mxu1 %v196_v21  ;;  %v200_v35 = vand.u32 4294901760, %v199_v32  ;;  %v224_v38 = vand.u32 4294901760, %v223_v36 }
  0x1a   : > { %328 = vmatpush.msrb.mxu3 %v192_v2  ;;  %410 = vmatpush.msrb.mxu1 %v192_v2  ;;  %v208_v39 = vand.u32 4294901760, %v207_v37  ;;  %v529_v61 = vand.u32 4294901760, %v528_v59  ;;  %v534_v62 = vsub.f32 %v532_v57, %v533_v60 }
  0x1b   : > { %217 = vmatmul.f32.vlgmr.msra.gmra.mxu2 %v216_v34  ;;  %201 = vmatmul.f32.vlgmr.msra.gmra.mxu0 %v200_v35 }
  0x1c   : > { %330 = vmatpush.msrb.mxu3 %v194_v3  ;;  %412 = vmatpush.msrb.mxu1 %v194_v3  ;;  %v535_v2 = vand.u32 4294901760, %v534_v62 }
  0x1d   : > { %461 = vmatpush.msra.mxu2 %v460_v41  ;;  %568 = vmatpush.msra.mxu0 %v514_v42 }
  0x1e   : > { %612 = vmatpush.msra.mxu1 %v460_v41  ;;  %518 = vmatpush.msra.mxu3 %v517_v47 }
  0x1f   : > { %463 = vmatpush.msra.mxu2 %v462_v46  ;;  %571 = vmatpush.msra.mxu0 %v520_v49 }
  0x20   : > { %614 = vmatpush.msra.mxu1 %v462_v46  ;;  %524 = vmatpush.msra.mxu3 %v523_v58 }
  0x21   : > { %268 = vmatmul.f32.gmra.mxu3 %v220_v20  ;;  %260 = vmatmul.f32.gmra.mxu1 %v204_v25 }
  0x22   : > { %465 = vmatpush.msra.mxu2 %v464_v50  ;;  %616 = vmatpush.msra.mxu1 %v464_v50 }
  0x23   : > { %225 = vmatmul.f32.gmra.mxu2 %v224_v38  ;;  %209 = vmatmul.f32.gmra.mxu0 %v208_v39 }
  0x24   : > { %574 = vmatpush.msra.mxu0 %v526_v53  ;;  %467 = vmatpush.msra.mxu2 %v466_v54 }
  0x25   : > { %618 = vmatpush.msra.mxu1 %v466_v54  ;;  %530 = vmatpush.msra.mxu3 %v529_v61 }
  0x26   : > { %577 = vmatpush.msra.mxu0 %v532_v57 }
  0x27   : > { %536 = vmatpush.msra.mxu3 %v535_v2 }
  0x29   : > { %334 = vmatmul.f32.vlgmr.msrb.gmra.mxu3 %v198_v29  ;;  %414 = vmatmul.f32.vlgmr.msrb.gmra.mxu1 %v196_v21 }
  0x2a   : > { %702 = vmatpush.msrb.mxu3 %v460_v41 }
  0x2b   : > { %294 = vmatmul.f32.vlgmr.msrb.gmra.mxu2 %v197_v26  ;;  %379 = vmatmul.f32.vlgmr.msrb.gmra.mxu0 %v196_v21 }
  0x2c   : > { %659 = vmatpush.msrb.mxu2 %v515_v43  ;;  %704 = vmatpush.msrb.mxu3 %v462_v46 }
  0x2e   : > { %663 = vmatpush.msrb.mxu2 %v521_v52  ;;  %706 = vmatpush.msrb.mxu3 %v464_v50 }
  0x30   : > { %667 = vmatpush.msrb.mxu2 %v527_v56  ;;  %708 = vmatpush.msrb.mxu3 %v466_v54 }
  0x31   : > { %340 = vmatmul.f32.gmra.mxu3 %v206_v33  ;;  %418 = vmatmul.f32.gmra.mxu1 %v204_v25 }
  0x32   : > { %671 = vmatpush.msrb.mxu2 %v533_v60 }
  0x33   : > { %299 = vmatmul.f32.gmra.mxu2 %v205_v28  ;;  %383 = vmatmul.f32.gmra.mxu0 %v204_v25 }
  0x39   : > { %346 = vmatmul.f32.gmra.mxu3 %v214_v27  ;;  %422 = vmatmul.f32.gmra.mxu1 %v212_v18 }
  0x3b   : > { %304 = vmatmul.f32.gmra.mxu2 %v213_v23  ;;  %387 = vmatmul.f32.gmra.mxu0 %v212_v18 }
  0x41   : > { %352 = vmatmul.f32.gmra.mxu3 %v222_v31  ;;  %426 = vmatmul.f32.gmra.mxu1 %v220_v20 }
  0x43   : > { %309 = vmatmul.f32.gmra.mxu2 %v221_v24  ;;  %391 = vmatmul.f32.gmra.mxu0 %v220_v20 }
  0x96   : > { %v257_v63 = vpop.f32.mrf.mxu1 }
  0x98   : > { %v202_v1 = vpop.f32.mrf.mxu0 }
  0x99   : > { %v203_v9 = vadd.f32 %v1105_v8, %v202_v1 }
  0x9b   : > { %v258_v13 = vadd.f32 %v257_v63, %v203_v9 }
  0x9c   : > { %v265_v0 = vpop.f32.mrf.mxu3 }
  0x9e   : > { %v218_v3 = vpop.f32.mrf.mxu2  ;;  %v261_v6 = vpop.f32.mrf.mxu1 }
  0x9f   : > { %v219_v27 = vadd.f32 %v1105_v8, %v218_v3 }
  0xa0   : > { %v210_v5 = vpop.f32.mrf.mxu0 }
  0xa1   : > { %v211_v16 = vadd.f32 %v1105_v8, %v210_v5  ;;  %v266_v34 = vadd.f32 %v265_v0, %v219_v27 }
  0xa3   : > { %v262_v21 = vadd.f32 %v261_v6, %v211_v16 }
  0xa4   : > { %v269_v4 = vpop.f32.mrf.mxu3 }
  0xa6   : > { %v226_v7 = vpop.f32.mrf.mxu2  ;;  %v415_v12 = vpop.f32.mrf.mxu1 }
  0xa7   : > { %v227_v43 = vadd.f32 %v1105_v8, %v226_v7 }
  0xa8   : > { %v380_v11 = vpop.f32.mrf.mxu0 }
  0xa9   : > { %v270_v50 = vadd.f32 %v269_v4, %v227_v43 }
  0xac   : > { %v335_v10 = vpop.f32.mrf.mxu3 }
  0xae   : > { %v295_v14 = vpop.f32.mrf.mxu2  ;;  %v419_v24 = vpop.f32.mrf.mxu1 }
  0xaf   : > { %v296_v15 = vadd.f32 %v295_v14, %v258_v13  ;;  %v158_v13 = vld [vmem:[%s1223_s1 + $0x58] sm:$0xff] }
  0xb0   : > { %v384_v20 = vpop.f32.mrf.mxu0  ;;  %v755_v14 = vand.u32 4294901760, %v158_v13 }
  0xb1   : > { %v336_v17 = vadd.f32 %v335_v10, %v296_v15 }
  0xb2   : > { %756 = vmatpush.msrb.mxu0 %v755_v14  ;;  %v809_v15 = vsub.f32 %v158_v13, %v755_v14 }
  0xb3   : > { %v381_v19 = vadd.f32 %v380_v11, %v336_v17 }
  0xb4   : > { %v341_v18 = vpop.f32.mrf.mxu3  ;;  %v810_v17 = vand.u32 4294901760, %v809_v15 }
  0xb5   : > { %v416_v22 = vadd.f32 %v415_v12, %v381_v19  ;;  %v157_v19 = vld [vmem:[%s1223_s1 + $0x50] sm:$0xff] }
  0xb6   : > { %v300_v23 = vpop.f32.mrf.mxu2  ;;  %v423_v41 = vpop.f32.mrf.mxu1 }
  0xb7   : > { %v430_v25 = vmax.f32 %v416_v22, 0.0  ;;  %v301_v26 = vadd.f32 %v300_v23, %v262_v21  ;;  %v156_v22 = vld [vmem:[%s1223_s1 + $0x48] sm:$0xff] }
  0xb8   : > { %v388_v38 = vpop.f32.mrf.mxu0 }
  0xb9   : > { %v437_v28 = vsel %vm435_vm1, %v430_v25, 0  ;;  %v342_v29 = vadd.f32 %v341_v18, %v301_v26  ;;  %v811_v18 = vsub.f32 %v809_v15, %v810_v17  ;;  %v155_v25 = vld [vmem:[%s1223_s1 + $0x40] sm:$0xff] }
  0xba   : > { %v1173_v30 = vand.u32 4294901760, %v437_v28 }
  0xbb   : > { %v385_v31 = vadd.f32 %v384_v20, %v342_v29  ;;  %v757_v20 = vand.u32 4294901760, %v157_v19  ;;  %v812_v21 = vand.u32 4294901760, %v811_v18 }
  0xbc   : > { %v469_v32 = vsub.f32 %v437_v28, %v1173_v30  ;;  %538 = vmatmul.f32.vlgmr.msra.gmra.mxu3 %v1173_v30  ;;  %v347_v33 = vpop.f32.mrf.mxu3  ;;  %v761_v28 = vand.u32 4294901760, %v155_v25 }
  0xbd   : > { %v420_v35 = vadd.f32 %v419_v24, %v385_v31  ;;  %907 = vmatpush.msra.mxu3 %v755_v14  ;;  %758 = vmatpush.msrb.mxu0 %v757_v20  ;;  %v815_v23 = vsub.f32 %v157_v19, %v757_v20  ;;  %v759_v24 = vand.u32 4294901760, %v156_v22 }
  0xbe   : > { %v305_v36 = vpop.f32.mrf.mxu2  ;;  %580 = vmatmul.f32.vlgmr.msra.gmra.mxu0 %v469_v32  ;;  %v470_v37 = vand.u32 4294901760, %v469_v32  ;;  %v427_v62 = vpop.f32.mrf.mxu1  ;;  %813 = vmatpush.msrb.mxu1 %v812_v21 }
  0xbf   : > { %v431_v39 = vmax.f32 %v420_v35, 0.0  ;;  %v306_v40 = vadd.f32 %v305_v36, %v266_v34  ;;  %909 = vmatpush.msra.mxu3 %v757_v20  ;;  %v816_v26 = vand.u32 4294901760, %v815_v23  ;;  %760 = vmatpush.msrb.mxu0 %v759_v24  ;;  %v821_v27 = vsub.f32 %v156_v22, %v759_v24 }
  0xc0   : > { %622 = vmatmul.f32.vlgmr.msra.gmra.mxu1 %v470_v37  ;;  %v471_v42 = vsub.f32 %v469_v32, %v470_v37  ;;  %v392_v57 = vpop.f32.mrf.mxu0 }
  0xc1   : > { %v440_v44 = vsel %vm435_vm1, %v431_v39, 0  ;;  %v348_v45 = vadd.f32 %v347_v33, %v306_v40  ;;  %911 = vmatpush.msra.mxu3 %v759_v24  ;;  %v817_v31 = vsub.f32 %v815_v23, %v816_v26  ;;  %v822_v32 = vand.u32 4294901760, %v821_v27  ;;  %762 = vmatpush.msrb.mxu0 %v761_v28 }
  0xc2   : > { %v476_v46 = vand.u32 4294901760, %v440_v44  ;;  %v472_v47 = vand.u32 4294901760, %v471_v42  ;;  %v827_v33 = vsub.f32 %v155_v25, %v761_v28  ;;  %v1106_v42 = vld [vmem:[%s1223_s1 + $0x38] ss:$0 sm:$0xff] }
  0xc3   : > { %v389_v48 = vadd.f32 %v388_v38, %v348_v45  ;;  %913 = vmatpush.msra.mxu3 %v761_v28  ;;  %954 = vmatpush.msra.mxu0 %v810_v17  ;;  %v818_v34 = vand.u32 4294901760, %v817_v31  ;;  %v823_v35 = vsub.f32 %v821_v27, %v822_v32 }
  0xc4   : > { %473 = vmatmul.f32.vlgmr.msra.gmra.mxu2 %v472_v47  ;;  %542 = vmatmul.f32.gmra.mxu3 %v476_v46  ;;  %v477_v49 = vsub.f32 %v440_v44, %v476_v46  ;;  %v353_v53 = vpop.f32.mrf.mxu3  ;;  %v828_v36 = vand.u32 4294901760, %v827_v33 }
  0xc5   : > { %v424_v51 = vadd.f32 %v423_v41, %v389_v48  ;;  %863 = vmatpush.msra.mxu2 %v809_v15  ;;  %958 = vmatpush.msra.mxu0 %v816_v26  ;;  %v824_v37 = vand.u32 4294901760, %v823_v35 }
  0xc6   : > { %v310_v52 = vpop.f32.mrf.mxu2  ;;  %585 = vmatmul.f32.gmra.mxu0 %v477_v49  ;;  %v478_v54 = vand.u32 4294901760, %v477_v49  ;;  %819 = vmatpush.msrb.mxu1 %v818_v34  ;;  %v829_v38 = vsub.f32 %v827_v33, %v828_v36 }
  0xc7   : > { %v432_v55 = vmax.f32 %v424_v51, 0.0  ;;  %v311_v56 = vadd.f32 %v310_v52, %v270_v50  ;;  %866 = vmatpush.msra.mxu2 %v815_v23  ;;  %962 = vmatpush.msra.mxu0 %v822_v32 }
  0xc8   : > { %628 = vmatmul.f32.gmra.mxu1 %v478_v54  ;;  %v479_v58 = vsub.f32 %v477_v49, %v478_v54  ;;  %v830_v39 = vand.u32 4294901760, %v829_v38 }
  0xc9   : > { %v443_v59 = vsel %vm435_vm1, %v432_v55, 0  ;;  %v354_v60 = vadd.f32 %v353_v53, %v311_v56  ;;  %869 = vmatpush.msra.mxu2 %v821_v27  ;;  %825 = vmatpush.msrb.mxu1 %v824_v37 }
  0xca   : > { %v484_v61 = vand.u32 4294901760, %v443_v59  ;;  %v480_v63 = vand.u32 4294901760, %v479_v58  ;;  %966 = vmatpush.msra.mxu0 %v828_v36 }
  0xcb   : > { %v393_v0 = vadd.f32 %v392_v57, %v354_v60  ;;  %872 = vmatpush.msra.mxu2 %v827_v33  ;;  %831 = vmatpush.msrb.mxu1 %v830_v39 }
  0xcc   : > { %481 = vmatmul.f32.gmra.mxu2 %v480_v63  ;;  %546 = vmatmul.f32.gmra.mxu3 %v484_v61  ;;  %v485_v1 = vsub.f32 %v443_v59, %v484_v61 }
  0xcd   : > { %v428_v2 = vadd.f32 %v427_v62, %v393_v0  ;;  %997 = vmatpush.msra.mxu1 %v755_v14 }
  0xce   : > { %590 = vmatmul.f32.gmra.mxu0 %v485_v1  ;;  %v486_v3 = vand.u32 4294901760, %v485_v1 }
  0xcf   : > { %v433_v4 = vmax.f32 %v428_v2, 0.0  ;;  %999 = vmatpush.msra.mxu1 %v757_v20 }
  0xd0   : > { %634 = vmatmul.f32.gmra.mxu1 %v486_v3  ;;  %v487_v5 = vsub.f32 %v485_v1, %v486_v3 }
  0xd1   : > { %v446_v6 = vsel %vm435_vm1, %v433_v4, 0  ;;  %1001 = vmatpush.msra.mxu1 %v759_v24 }
  0xd2   : > { %v492_v7 = vand.u32 4294901760, %v446_v6  ;;  %v488_v8 = vand.u32 4294901760, %v487_v5 }
  0xd3   : > { %1003 = vmatpush.msra.mxu1 %v761_v28 }
  0xd4   : > { %489 = vmatmul.f32.gmra.mxu2 %v488_v8  ;;  %550 = vmatmul.f32.gmra.mxu3 %v492_v7  ;;  %v493_v9 = vsub.f32 %v446_v6, %v492_v7 }
  0xd6   : > { %595 = vmatmul.f32.gmra.mxu0 %v493_v9  ;;  %v494_v10 = vand.u32 4294901760, %v493_v9 }
  0xd8   : > { %640 = vmatmul.f32.gmra.mxu1 %v494_v10  ;;  %v495_v11 = vsub.f32 %v493_v9, %v494_v10 }
  0xda   : > { %v496_v12 = vand.u32 4294901760, %v495_v11 }
  0xdc   : > { %497 = vmatmul.f32.gmra.mxu2 %v496_v12  ;;  %710 = vmatmul.f32.vlgmr.msrb.gmra.mxu3 %v1173_v30 }
  0xe4   : > { %673 = vmatmul.f32.vlgmr.msrb.gmra.mxu2 %v1173_v30  ;;  %714 = vmatmul.f32.gmra.mxu3 %v476_v46 }
  0xec   : > { %677 = vmatmul.f32.gmra.mxu2 %v476_v46  ;;  %718 = vmatmul.f32.gmra.mxu3 %v484_v61 }
  0xf4   : > { %681 = vmatmul.f32.gmra.mxu2 %v484_v61  ;;  %722 = vmatmul.f32.gmra.mxu3 %v492_v7 }
  0xfc   : > { %685 = vmatmul.f32.gmra.mxu2 %v492_v7 }
 0x13b   : > { %v581_v46 = vpop.f32.mrf.mxu0 }
 0x13d   : > { %v623_v48 = vpop.f32.mrf.mxu1 }
 0x13f   : > { %v539_v16 = vpop.f32.mrf.mxu3 }
 0x143   : > { %v586_v53 = vpop.f32.mrf.mxu0 }
 0x145   : > { %v629_v58 = vpop.f32.mrf.mxu1 }
 0x147   : > { %v474_v29 = vpop.f32.mrf.mxu2  ;;  %v543_v30 = vpop.f32.mrf.mxu3 }
 0x148   : > { %v475_v45 = vadd.f32 %v1106_v42, %v474_v29 }
 0x14a   : > { %v540_v47 = vadd.f32 %v539_v16, %v475_v45 }
 0x14b   : > { %v591_v3 = vpop.f32.mrf.mxu0 }
 0x14c   : > { %v582_v51 = vadd.f32 %v581_v46, %v540_v47 }
 0x14d   : > { %v635_v11 = vpop.f32.mrf.mxu1 }
 0x14e   : > { %v624_v55 = vadd.f32 %v623_v48, %v582_v51 }
 0x14f   : > { %v482_v40 = vpop.f32.mrf.mxu2  ;;  %v547_v41 = vpop.f32.mrf.mxu3 }
 0x150   : > { %v483_v50 = vadd.f32 %v1106_v42, %v482_v40 }
 0x152   : > { %v544_v54 = vadd.f32 %v543_v30, %v483_v50 }
 0x153   : > { %v596_v23 = vpop.f32.mrf.mxu0 }
 0x154   : > { %v587_v61 = vadd.f32 %v586_v53, %v544_v54 }
 0x155   : > { %v641_v29 = vpop.f32.mrf.mxu1 }
 0x156   : > { %v630_v2 = vadd.f32 %v629_v58, %v587_v61 }
 0x157   : > { %v490_v43 = vpop.f32.mrf.mxu2  ;;  %v551_v44 = vpop.f32.mrf.mxu3 }
 0x158   : > { %v491_v59 = vadd.f32 %v1106_v42, %v490_v43 }
 0x15a   : > { %v548_v0 = vadd.f32 %v547_v41, %v491_v59 }
 0x15c   : > { %v592_v10 = vadd.f32 %v591_v3, %v548_v0 }
 0x15e   : > { %v636_v17 = vadd.f32 %v635_v11, %v592_v10 }
 0x15f   : > { %v498_v49 = vpop.f32.mrf.mxu2  ;;  %v711_v52 = vpop.f32.mrf.mxu3 }
 0x160   : > { %v499_v8 = vadd.f32 %v1106_v42, %v498_v49 }
 0x162   : > { %v552_v15 = vadd.f32 %v551_v44, %v499_v8 }
 0x164   : > { %v597_v26 = vadd.f32 %v596_v23, %v552_v15 }
 0x166   : > { %v642_v32 = vadd.f32 %v641_v29, %v597_v26 }
 0x167   : > { %v674_v56 = vpop.f32.mrf.mxu2  ;;  %v715_v63 = vpop.f32.mrf.mxu3 }
 0x168   : > { %v675_v57 = vadd.f32 %v674_v56, %v624_v55  ;;  %v1107_v55 = vld [vmem:[%s1223_s1 + $0x60] ss:$0 sm:$0xff] }
 0x16a   : > { %v712_v60 = vadd.f32 %v711_v52, %v675_v57 }
 0x16c   : > { %v726_v62 = vmax.f32 %v712_v60, 0.0 }
 0x16e   : > { %v732_v1 = vsel %vm435_vm1, %v726_v62, 0 }
 0x16f   : > { %v763_v4 = vand.u32 4294901760, %v732_v1  ;;  %v678_v5 = vpop.f32.mrf.mxu2  ;;  %v719_v19 = vpop.f32.mrf.mxu3 }
 0x170   : > { %v679_v6 = vadd.f32 %v678_v5, %v630_v2 }
 0x171   : > { %v764_v7 = vsub.f32 %v732_v1, %v763_v4  ;;  %833 = vmatmul.f32.vlgmr.msrb.gmra.mxu1 %v763_v4 }
 0x172   : > { %v716_v9 = vadd.f32 %v715_v63, %v679_v6 }
 0x173   : > { %875 = vmatmul.f32.vlgmr.msra.gmra.mxu2 %v764_v7  ;;  %v765_v12 = vand.u32 4294901760, %v764_v7 }
 0x174   : > { %v727_v13 = vmax.f32 %v716_v9, 0.0 }
 0x175   : > { %917 = vmatmul.f32.vlgmr.msra.gmra.mxu3 %v765_v12  ;;  %v766_v14 = vsub.f32 %v764_v7, %v765_v12 }
 0x176   : > { %v735_v16 = vsel %vm435_vm1, %v727_v13, 0 }
 0x177   : > { %v771_v18 = vand.u32 4294901760, %v735_v16  ;;  %v682_v20 = vpop.f32.mrf.mxu2  ;;  %v767_v21 = vand.u32 4294901760, %v766_v14  ;;  %v723_v37 = vpop.f32.mrf.mxu3 }
 0x178   : > { %v683_v22 = vadd.f32 %v682_v20, %v636_v17 }
 0x179   : > { %768 = vmatmul.f32.vlgmr.msrb.gmra.mxu0 %v767_v21  ;;  %837 = vmatmul.f32.gmra.mxu1 %v771_v18  ;;  %v772_v24 = vsub.f32 %v735_v16, %v771_v18 }
 0x17a   : > { %v720_v25 = vadd.f32 %v719_v19, %v683_v22 }
 0x17b   : > { %880 = vmatmul.f32.gmra.mxu2 %v772_v24  ;;  %v773_v27 = vand.u32 4294901760, %v772_v24 }
 0x17c   : > { %v728_v28 = vmax.f32 %v720_v25, 0.0 }
 0x17d   : > { %923 = vmatmul.f32.gmra.mxu3 %v773_v27  ;;  %v774_v30 = vsub.f32 %v772_v24, %v773_v27 }
 0x17e   : > { %v738_v31 = vsel %vm435_vm1, %v728_v28, 0 }
 0x17f   : > { %v779_v33 = vand.u32 4294901760, %v738_v31  ;;  %v686_v34 = vpop.f32.mrf.mxu2  ;;  %v775_v35 = vand.u32 4294901760, %v774_v30 }
 0x180   : > { %v687_v36 = vadd.f32 %v686_v34, %v642_v32 }
 0x181   : > { %776 = vmatmul.f32.gmra.mxu0 %v775_v35  ;;  %841 = vmatmul.f32.gmra.mxu1 %v779_v33  ;;  %v780_v38 = vsub.f32 %v738_v31, %v779_v33 }
 0x182   : > { %v724_v39 = vadd.f32 %v723_v37, %v687_v36 }
 0x183   : > { %885 = vmatmul.f32.gmra.mxu2 %v780_v38  ;;  %v781_v40 = vand.u32 4294901760, %v780_v38 }
 0x184   : > { %v729_v41 = vmax.f32 %v724_v39, 0.0 }
 0x185   : > { %929 = vmatmul.f32.gmra.mxu3 %v781_v40  ;;  %v782_v42 = vsub.f32 %v780_v38, %v781_v40 }
 0x186   : > { %v741_v43 = vsel %vm435_vm1, %v729_v41, 0 }
 0x187   : > { %v787_v44 = vand.u32 4294901760, %v741_v43  ;;  %v783_v45 = vand.u32 4294901760, %v782_v42 }
 0x189   : > { %784 = vmatmul.f32.gmra.mxu0 %v783_v45  ;;  %845 = vmatmul.f32.gmra.mxu1 %v787_v44  ;;  %v788_v46 = vsub.f32 %v741_v43, %v787_v44 }
 0x18b   : > { %890 = vmatmul.f32.gmra.mxu2 %v788_v46  ;;  %v789_v47 = vand.u32 4294901760, %v788_v46 }
 0x18d   : > { %935 = vmatmul.f32.gmra.mxu3 %v789_v47  ;;  %v790_v48 = vsub.f32 %v788_v46, %v789_v47 }
 0x18f   : > { %v791_v49 = vand.u32 4294901760, %v790_v48 }
 0x191   : > { %792 = vmatmul.f32.gmra.mxu0 %v791_v49  ;;  %1005 = vmatmul.f32.vlgmr.msra.gmra.mxu1 %v763_v4 }
 0x199   : > { %968 = vmatmul.f32.vlgmr.msra.gmra.mxu0 %v763_v4  ;;  %1009 = vmatmul.f32.gmra.mxu1 %v771_v18 }
 0x1a1   : > { %972 = vmatmul.f32.gmra.mxu0 %v771_v18  ;;  %1013 = vmatmul.f32.gmra.mxu1 %v779_v33 }
 0x1a9   : > { %976 = vmatmul.f32.gmra.mxu0 %v779_v33  ;;  %1017 = vmatmul.f32.gmra.mxu1 %v787_v44 }
 0x1b1   : > { %980 = vmatmul.f32.gmra.mxu0 %v787_v44 }
 0x1ee   : > { %v834_v50 = vpop.f32.mrf.mxu1 }
 0x1f6   : > { %v769_v51 = vpop.f32.mrf.mxu0  ;;  %v838_v52 = vpop.f32.mrf.mxu1 }
 0x1f7   : > { %v770_v58 = vadd.f32 %v1107_v55, %v769_v51  ;;  %v876_v59 = vpop.f32.mrf.mxu2 }
 0x1f8   : > { %v918_v61 = vpop.f32.mrf.mxu3 }
 0x1f9   : > { %v835_v60 = vadd.f32 %v834_v50, %v770_v58 }
 0x1fb   : > { %v877_v63 = vadd.f32 %v876_v59, %v835_v60 }
 0x1fd   : > { %v919_v3 = vadd.f32 %v918_v61, %v877_v63 }
 0x1fe   : > { %v777_v53 = vpop.f32.mrf.mxu0  ;;  %v842_v54 = vpop.f32.mrf.mxu1 }
 0x1ff   : > { %v778_v0 = vadd.f32 %v1107_v55, %v777_v53  ;;  %v881_v2 = vpop.f32.mrf.mxu2 }
 0x200   : > { %v924_v7 = vpop.f32.mrf.mxu3 }
 0x201   : > { %v839_v4 = vadd.f32 %v838_v52, %v778_v0 }
 0x203   : > { %v882_v8 = vadd.f32 %v881_v2, %v839_v4 }
 0x205   : > { %v925_v12 = vadd.f32 %v924_v7, %v882_v8 }
 0x206   : > { %v785_v56 = vpop.f32.mrf.mxu0  ;;  %v846_v57 = vpop.f32.mrf.mxu1 }
 0x207   : > { %v786_v9 = vadd.f32 %v1107_v55, %v785_v56  ;;  %v886_v14 = vpop.f32.mrf.mxu2 }
 0x208   : > { %v930_v20 = vpop.f32.mrf.mxu3 }
 0x209   : > { %v843_v13 = vadd.f32 %v842_v54, %v786_v9 }
 0x20b   : > { %v887_v17 = vadd.f32 %v886_v14, %v843_v13 }
 0x20d   : > { %v931_v21 = vadd.f32 %v930_v20, %v887_v17 }
 0x20e   : > { %v793_v62 = vpop.f32.mrf.mxu0  ;;  %v1006_v1 = vpop.f32.mrf.mxu1 }
 0x20f   : > { %v794_v18 = vadd.f32 %v1107_v55, %v793_v62  ;;  %v891_v26 = vpop.f32.mrf.mxu2 }
 0x210   : > { %v936_v29 = vpop.f32.mrf.mxu3 }
 0x211   : > { %v847_v22 = vadd.f32 %v846_v57, %v794_v18 }
 0x213   : > { %v892_v27 = vadd.f32 %v891_v26, %v847_v22 }
 0x215   : > { %v937_v30 = vadd.f32 %v936_v29, %v892_v27 }
 0x216   : > { %v969_v5 = vpop.f32.mrf.mxu0  ;;  %v1010_v11 = vpop.f32.mrf.mxu1 }
 0x217   : > { %v970_v6 = vadd.f32 %v969_v5, %v919_v3 }
 0x219   : > { %v1007_v10 = vadd.f32 %v1006_v1, %v970_v6 }
 0x21b   : > { %1022 = vst.msk [vmem:[%s1209_s19] sm:$0xff] %vm1021_vm2, %v1007_v10 }
 0x21e   : > { %v973_v15 = vpop.f32.mrf.mxu0  ;;  %v1014_v23 = vpop.f32.mrf.mxu1 }
 0x21f   : > { %v974_v16 = vadd.f32 %v973_v15, %v925_v12 }
 0x221   : > { %v1011_v19 = vadd.f32 %v1010_v11, %v974_v16 }
 0x223   : > { %1023 = vst.msk [vmem:[%s1209_s19 + $0x8] sm:$0xff] %vm1021_vm2, %v1011_v19 }
 0x226   : > { %v977_v24 = vpop.f32.mrf.mxu0  ;;  %v1018_v33 = vpop.f32.mrf.mxu1 }
 0x227   : > { %v978_v25 = vadd.f32 %v977_v24, %v931_v21 }
 0x229   : > { %v1015_v28 = vadd.f32 %v1014_v23, %v978_v25 }
 0x22b   : > { %1024 = vst.msk [vmem:[%s1209_s19 + $0x10] sm:$0xff] %vm1021_vm2, %v1015_v28 }
 0x22e   : > { %v981_v31 = vpop.f32.mrf.mxu0 }
 0x22f   : > { %v982_v32 = vadd.f32 %v981_v31, %v937_v30 }
 0x231   : > { %v1019_v34 = vadd.f32 %v1018_v33, %v982_v32 }
 0x233   : > { %1025 = vst.msk [vmem:[%s1209_s19 + $0x18] sm:$0xff] %vm1021_vm2, %v1019_v34 }
 0x234 PF: > { %s12_s9 = sadd.s32 1, %s1114_s9  }
 0x235   : > { %p9_p4 = scmp.ge.s32.totalorder %s12_s9, 4  }
 0x237   :  { %11 = sbr.rel (!%p9_p4) target bundleno = 1 (0x1), region = 58 }

</bundles_post_ra>
